<compile_context>
chip_gen: v7x
topology: tpu7x:2x2x1
jax: 0.10.0
libtpu: 0.0.40
codegen_flags: <defaults>
</compile_context>

<pallas_src>
import jax
import jax.numpy as jnp
from jax.experimental import pallas as pl
from jax.experimental.pallas import tpu as pltpu


def policy_kernel(
    obs_ref,                      # (obs_dim, TILE_B) f32
    w1_ref, b1_ref,
    w2_ref, b2_ref,
    w3_ref, b3_ref,
    w4_ref, b4_ref,
    w5_ref, b5_ref,               # W: (out, in) bf16, b: (out, 1) f32
    max_a_ref, min_a_ref,         # (act_dim, 1) f32
    out_ref,                      # (act_dim, TILE_B) f32
):
    # Cast the streamed f32 obs tile to bf16 on the VPU (hidden under DMA/MXU),
    # keeping obs HBM traffic at 4 B/elem (no separate wrapper-side bf16 copy).
    x = obs_ref[...].astype(jnp.bfloat16)

    def layer(w_ref, b_ref, x, relu):
        h = jnp.dot(w_ref[...], x, preferred_element_type=jnp.float32) + b_ref[...]
        if relu:
            h = jnp.maximum(h, 0.0)
        return h

    # latent MLP: three Linear+ReLU layers
    h = layer(w1_ref, b1_ref, x, True).astype(jnp.bfloat16)
    h = layer(w2_ref, b2_ref, h, True).astype(jnp.bfloat16)
    h = layer(w3_ref, b3_ref, h, True).astype(jnp.bfloat16)
    # out_layer MLP: Linear+ReLU, then final Linear (no output activation)
    h = layer(w4_ref, b4_ref, h, True).astype(jnp.bfloat16)
    y = layer(w5_ref, b5_ref, h, False)

    # clamp in f32: max(min(max_action, y), min_action), broadcast over lanes (batch)
    y = jnp.maximum(jnp.minimum(max_a_ref[...], y), min_a_ref[...])
    out_ref[...] = y.astype(out_ref.dtype)


def _round_up(x, m):
    return ((x + m - 1) // m) * m


def prepare_params(params):
    """Pre-cast parameters ONCE (not per forward call).

    params: list of (W, b) with torch nn.Linear layout W:(out, in) f32, b:(out,) f32.
    Returns list of (W bf16 (out, in), b f32 (out, 1)).
    """
    prepared = []
    for w, b in params:
        prepared.append((jnp.asarray(w, jnp.bfloat16),
                         jnp.asarray(b, jnp.float32).reshape(-1, 1)))
    return prepared


def deterministic_policy_forward(obs, prepared_params, max_action, min_action,
                                 tile_b=4096):
    """obs: (B, obs_dim) f32.  prepared_params from prepare_params().
    max_action/min_action: (act_dim,) f32 action bounds.  Returns (B, act_dim) f32."""
    batch, obs_dim = obs.shape
    act_dim = prepared_params[-1][0].shape[0]

    # Batch lives on the lane (last) dim -> pad only to the 128-lane granule.
    padded_b = _round_up(batch, 128)
    tile_b = max(128, min(_round_up(tile_b, 128), padded_b))
    # Keep >= 2 grid steps when the batch allows, so v7x shards across both TCs.
    if padded_b >= 256:
        tile_b = min(tile_b, _round_up(pl.cdiv(padded_b, 2), 128))

    obs_t = jnp.transpose(obs.astype(jnp.float32))          # (obs_dim, batch)
    if padded_b != batch:
        obs_t = jnp.pad(obs_t, ((0, 0), (0, padded_b - batch)))

    flat_args = [obs_t]
    in_specs = [pl.BlockSpec((obs_dim, tile_b), lambda i: (0, i))]
    for w, b in prepared_params:
        flat_args += [w, b]
        in_specs += [
            pl.BlockSpec(w.shape, lambda i: (0, 0)),   # weights resident in VMEM
            pl.BlockSpec(b.shape, lambda i: (0, 0)),
        ]
    max_a = jnp.asarray(max_action, jnp.float32).reshape(-1, 1)
    min_a = jnp.asarray(min_action, jnp.float32).reshape(-1, 1)
    flat_args += [max_a, min_a]
    in_specs += [
        pl.BlockSpec(max_a.shape, lambda i: (0, 0)),
        pl.BlockSpec(min_a.shape, lambda i: (0, 0)),
    ]

    out_t = pl.pallas_call(
        policy_kernel,
        out_shape=jax.ShapeDtypeStruct((act_dim, padded_b), jnp.float32),
        grid=(pl.cdiv(padded_b, tile_b),),
        in_specs=in_specs,
        out_specs=pl.BlockSpec((act_dim, tile_b), lambda i: (0, i)),
        compiler_params=pltpu.CompilerParams(
            dimension_semantics=("parallel",),  # batch tiles shard across TCs (v7x)
        ),
    )(*flat_args)
    return jnp.transpose(out_t[:, :batch])                  # (batch, act_dim)


def init_linear(key, in_dim, out_dim):
    """Deterministic init mimicking torch.nn.Linear default (uniform +-1/sqrt(in)),
    in the torch layout: W (out, in), b (out,)."""
    kw, kb = jax.random.split(key)
    bound = 1.0 / jnp.sqrt(jnp.float32(in_dim))
    w = jax.random.uniform(kw, (out_dim, in_dim), jnp.float32, -bound, bound)
    b = jax.random.uniform(kb, (out_dim,), jnp.float32, -bound, bound)
    return w, b


def reference_forward(obs, params, max_action, min_action):
    h = obs
    # layers 1..4 have ReLU, layer 5 is linear
    for i, (w, b) in enumerate(params):
        h = h @ w.T + b
        if i < 4:
            h = jnp.maximum(h, 0.0)
    return jnp.maximum(jnp.minimum(max_action, h), min_action)


if __name__ == "__main__":
    batch, obs_dim, hidden_dim, act_dim = 4, 16, 32, 8

    key = jax.random.PRNGKey(0)
    keys = jax.random.split(key, 7)

    # latent: obs->H, H->H, H->H ; out_layer: H->H, H->act
    params = [
        init_linear(keys[0], obs_dim, hidden_dim),
        init_linear(keys[1], hidden_dim, hidden_dim),
        init_linear(keys[2], hidden_dim, hidden_dim),
        init_linear(keys[3], hidden_dim, hidden_dim),
        init_linear(keys[4], hidden_dim, act_dim),
    ]
    prepared = prepare_params(params)   # bf16 weights / (out,1) f32 biases, cast once

    max_action = jnp.full((act_dim,), 0.5, dtype=jnp.float32)
    min_action = jnp.full((act_dim,), -0.5, dtype=jnp.float32)

    obs = jax.random.normal(keys[5], (batch, obs_dim), dtype=jnp.float32)

    out = deterministic_policy_forward(obs, prepared, max_action, min_action)
    out = jax.block_until_ready(out)

    ref = reference_forward(obs, params, max_action, min_action)
    assert out.shape == (batch, act_dim)
    # bf16 weights/activations -> compare against the f32 reference with loose tolerance.
    assert jnp.allclose(out, ref, atol=2e-2, rtol=2e-2), "mismatch vs reference"

    print("KERNEL_OK")
</pallas_src>

<mosaic_0001>
module attributes {stable_mosaic.version = 11 : i64} {
  func.func @policy_kernel(%arg0: i32, %arg1: memref<16x128xf32, #tpu.memory_space<vmem>>, %arg2: memref<32x16xbf16, #tpu.memory_space<vmem>>, %arg3: memref<32x1xf32, #tpu.memory_space<vmem>>, %arg4: memref<32x32xbf16, #tpu.memory_space<vmem>>, %arg5: memref<32x1xf32, #tpu.memory_space<vmem>>, %arg6: memref<32x32xbf16, #tpu.memory_space<vmem>>, %arg7: memref<32x1xf32, #tpu.memory_space<vmem>>, %arg8: memref<32x32xbf16, #tpu.memory_space<vmem>>, %arg9: memref<32x1xf32, #tpu.memory_space<vmem>>, %arg10: memref<8x32xbf16, #tpu.memory_space<vmem>>, %arg11: memref<8x1xf32, #tpu.memory_space<vmem>>, %arg12: memref<8x1xf32, #tpu.memory_space<vmem>>, %arg13: memref<8x1xf32, #tpu.memory_space<vmem>>, %arg14: memref<8x128xf32, #tpu.memory_space<vmem>>) attributes {dimension_semantics = [#tpu.dimension_semantics<parallel>], iteration_bounds = array<i64: 1>, scalar_prefetch = 0 : i64, scratch_operands = 0 : i64, tpu.core_type = #tpu.core_type<tc>, window_params = [{transform_indices = @transform_0, window_bounds = array<i64: 16, 128>}, {pipeline_mode = #tpu.pipeline_mode<synchronous>, transform_indices = @transform_1, window_bounds = array<i64: 32, 16>}, {pipeline_mode = #tpu.pipeline_mode<synchronous>, transform_indices = @transform_2, window_bounds = array<i64: 32, 1>}, {pipeline_mode = #tpu.pipeline_mode<synchronous>, transform_indices = @transform_3, window_bounds = array<i64: 32, 32>}, {pipeline_mode = #tpu.pipeline_mode<synchronous>, transform_indices = @transform_4, window_bounds = array<i64: 32, 1>}, {pipeline_mode = #tpu.pipeline_mode<synchronous>, transform_indices = @transform_5, window_bounds = array<i64: 32, 32>}, {pipeline_mode = #tpu.pipeline_mode<synchronous>, transform_indices = @transform_6, window_bounds = array<i64: 32, 1>}, {pipeline_mode = #tpu.pipeline_mode<synchronous>, transform_indices = @transform_7, window_bounds = array<i64: 32, 32>}, {pipeline_mode = #tpu.pipeline_mode<synchronous>, transform_indices = @transform_8, window_bounds = array<i64: 32, 1>}, {pipeline_mode = #tpu.pipeline_mode<synchronous>, transform_indices = @transform_9, window_bounds = array<i64: 8, 32>}, {pipeline_mode = #tpu.pipeline_mode<synchronous>, transform_indices = @transform_10, window_bounds = array<i64: 8, 1>}, {pipeline_mode = #tpu.pipeline_mode<synchronous>, transform_indices = @transform_11, window_bounds = array<i64: 8, 1>}, {pipeline_mode = #tpu.pipeline_mode<synchronous>, transform_indices = @transform_12, window_bounds = array<i64: 8, 1>}, {transform_indices = @transform_13, window_bounds = array<i64: 8, 128>}]} {
    %c0 = arith.constant 0 : index
    %c0_0 = arith.constant 0 : index
    %0 = vector.load %arg1[%c0, %c0_0] : memref<16x128xf32, #tpu.memory_space<vmem>>, vector<16x128xf32>
    %1 = arith.truncf %0 : vector<16x128xf32> to vector<16x128xbf16>
    %c0_1 = arith.constant 0 : index
    %c0_2 = arith.constant 0 : index
    %2 = vector.load %arg2[%c0_1, %c0_2] : memref<32x16xbf16, #tpu.memory_space<vmem>>, vector<32x16xbf16>
    %cst = arith.constant dense<0.000000e+00> : vector<32x128xf32>
    %3 = tpu.matmul %2, %1, %cst {dimension_numbers = #tpu.dot_dimension_numbers<[1], [0], [0], [1], [0, 0, 1, 1], [], []>} : vector<32x16xbf16>, vector<16x128xbf16>, vector<32x128xf32> -> vector<32x128xf32>
    %c0_3 = arith.constant 0 : index
    %c0_4 = arith.constant 0 : index
    %4 = vector.load %arg3[%c0_3, %c0_4] : memref<32x1xf32, #tpu.memory_space<vmem>>, vector<32x1xf32>
    %5 = vector.broadcast %4 : vector<32x1xf32> to vector<32x128xf32>
    %6 = arith.addf %3, %5 : vector<32x128xf32>
    %cst_5 = arith.constant 0.000000e+00 : f32
    %7 = vector.broadcast %cst_5 : f32 to vector<32x128xf32>
    %8 = arith.maximumf %6, %7 : vector<32x128xf32>
    %9 = arith.truncf %8 : vector<32x128xf32> to vector<32x128xbf16>
    %c0_6 = arith.constant 0 : index
    %c0_7 = arith.constant 0 : index
    %10 = vector.load %arg4[%c0_6, %c0_7] : memref<32x32xbf16, #tpu.memory_space<vmem>>, vector<32x32xbf16>
    %cst_8 = arith.constant dense<0.000000e+00> : vector<32x128xf32>
    %11 = tpu.matmul %10, %9, %cst_8 {dimension_numbers = #tpu.dot_dimension_numbers<[1], [0], [0], [1], [0, 0, 1, 1], [], []>} : vector<32x32xbf16>, vector<32x128xbf16>, vector<32x128xf32> -> vector<32x128xf32>
    %c0_9 = arith.constant 0 : index
    %c0_10 = arith.constant 0 : index
    %12 = vector.load %arg5[%c0_9, %c0_10] : memref<32x1xf32, #tpu.memory_space<vmem>>, vector<32x1xf32>
    %13 = vector.broadcast %12 : vector<32x1xf32> to vector<32x128xf32>
    %14 = arith.addf %11, %13 : vector<32x128xf32>
    %cst_11 = arith.constant 0.000000e+00 : f32
    %15 = vector.broadcast %cst_11 : f32 to vector<32x128xf32>
    %16 = arith.maximumf %14, %15 : vector<32x128xf32>
    %17 = arith.truncf %16 : vector<32x128xf32> to vector<32x128xbf16>
    %c0_12 = arith.constant 0 : index
    %c0_13 = arith.constant 0 : index
    %18 = vector.load %arg6[%c0_12, %c0_13] : memref<32x32xbf16, #tpu.memory_space<vmem>>, vector<32x32xbf16>
    %cst_14 = arith.constant dense<0.000000e+00> : vector<32x128xf32>
    %19 = tpu.matmul %18, %17, %cst_14 {dimension_numbers = #tpu.dot_dimension_numbers<[1], [0], [0], [1], [0, 0, 1, 1], [], []>} : vector<32x32xbf16>, vector<32x128xbf16>, vector<32x128xf32> -> vector<32x128xf32>
    %c0_15 = arith.constant 0 : index
    %c0_16 = arith.constant 0 : index
    %20 = vector.load %arg7[%c0_15, %c0_16] : memref<32x1xf32, #tpu.memory_space<vmem>>, vector<32x1xf32>
    %21 = vector.broadcast %20 : vector<32x1xf32> to vector<32x128xf32>
    %22 = arith.addf %19, %21 : vector<32x128xf32>
    %cst_17 = arith.constant 0.000000e+00 : f32
    %23 = vector.broadcast %cst_17 : f32 to vector<32x128xf32>
    %24 = arith.maximumf %22, %23 : vector<32x128xf32>
    %25 = arith.truncf %24 : vector<32x128xf32> to vector<32x128xbf16>
    %c0_18 = arith.constant 0 : index
    %c0_19 = arith.constant 0 : index
    %26 = vector.load %arg8[%c0_18, %c0_19] : memref<32x32xbf16, #tpu.memory_space<vmem>>, vector<32x32xbf16>
    %cst_20 = arith.constant dense<0.000000e+00> : vector<32x128xf32>
    %27 = tpu.matmul %26, %25, %cst_20 {dimension_numbers = #tpu.dot_dimension_numbers<[1], [0], [0], [1], [0, 0, 1, 1], [], []>} : vector<32x32xbf16>, vector<32x128xbf16>, vector<32x128xf32> -> vector<32x128xf32>
    %c0_21 = arith.constant 0 : index
    %c0_22 = arith.constant 0 : index
    %28 = vector.load %arg9[%c0_21, %c0_22] : memref<32x1xf32, #tpu.memory_space<vmem>>, vector<32x1xf32>
    %29 = vector.broadcast %28 : vector<32x1xf32> to vector<32x128xf32>
    %30 = arith.addf %27, %29 : vector<32x128xf32>
    %cst_23 = arith.constant 0.000000e+00 : f32
    %31 = vector.broadcast %cst_23 : f32 to vector<32x128xf32>
    %32 = arith.maximumf %30, %31 : vector<32x128xf32>
    %33 = arith.truncf %32 : vector<32x128xf32> to vector<32x128xbf16>
    %c0_24 = arith.constant 0 : index
    %c0_25 = arith.constant 0 : index
    %34 = vector.load %arg10[%c0_24, %c0_25] : memref<8x32xbf16, #tpu.memory_space<vmem>>, vector<8x32xbf16>
    %cst_26 = arith.constant dense<0.000000e+00> : vector<8x128xf32>
    %35 = tpu.matmul %34, %33, %cst_26 {dimension_numbers = #tpu.dot_dimension_numbers<[1], [0], [0], [1], [0, 0, 1, 1], [], []>} : vector<8x32xbf16>, vector<32x128xbf16>, vector<8x128xf32> -> vector<8x128xf32>
    %c0_27 = arith.constant 0 : index
    %c0_28 = arith.constant 0 : index
    %36 = vector.load %arg11[%c0_27, %c0_28] : memref<8x1xf32, #tpu.memory_space<vmem>>, vector<8x1xf32>
    %37 = vector.broadcast %36 : vector<8x1xf32> to vector<8x128xf32>
    %38 = arith.addf %35, %37 : vector<8x128xf32>
    %c0_29 = arith.constant 0 : index
    %c0_30 = arith.constant 0 : index
    %39 = vector.load %arg12[%c0_29, %c0_30] : memref<8x1xf32, #tpu.memory_space<vmem>>, vector<8x1xf32>
    %40 = vector.broadcast %39 : vector<8x1xf32> to vector<8x128xf32>
    %41 = arith.minimumf %40, %38 : vector<8x128xf32>
    %c0_31 = arith.constant 0 : index
    %c0_32 = arith.constant 0 : index
    %42 = vector.load %arg13[%c0_31, %c0_32] : memref<8x1xf32, #tpu.memory_space<vmem>>, vector<8x1xf32>
    %43 = vector.broadcast %42 : vector<8x1xf32> to vector<8x128xf32>
    %44 = arith.maximumf %41, %43 : vector<8x128xf32>
    %c0_33 = arith.constant 0 : index
    %c0_34 = arith.constant 0 : index
    %45 = vector.load %arg14[%c0_33, %c0_34] : memref<8x128xf32, #tpu.memory_space<vmem>>, vector<8x128xf32>
    tpu.vector_store %arg14[%c0_33, %c0_34], %44 {strides = array<i32>} : memref<8x128xf32, #tpu.memory_space<vmem>>, vector<8x128xf32>,
    return
  }
  func.func @transform_0(%arg0: i32) -> (i32, i32) {
    %c0_i32 = arith.constant 0 : i32
    %c0_i32_0 = arith.constant 0 : i32
    return %c0_i32, %arg0 : i32, i32
  }
  func.func @transform_1(%arg0: i32) -> (i32, i32) {
    %c0_i32 = arith.constant 0 : i32
    %c0_i32_0 = arith.constant 0 : i32
    %c0_i32_1 = arith.constant 0 : i32
    return %c0_i32, %c0_i32_0 : i32, i32
  }
  func.func @transform_2(%arg0: i32) -> (i32, i32) {
    %c0_i32 = arith.constant 0 : i32
    %c0_i32_0 = arith.constant 0 : i32
    %c0_i32_1 = arith.constant 0 : i32
    return %c0_i32, %c0_i32_0 : i32, i32
  }
  func.func @transform_3(%arg0: i32) -> (i32, i32) {
    %c0_i32 = arith.constant 0 : i32
    %c0_i32_0 = arith.constant 0 : i32
    %c0_i32_1 = arith.constant 0 : i32
    return %c0_i32, %c0_i32_0 : i32, i32
  }
  func.func @transform_4(%arg0: i32) -> (i32, i32) {
    %c0_i32 = arith.constant 0 : i32
    %c0_i32_0 = arith.constant 0 : i32
    %c0_i32_1 = arith.constant 0 : i32
    return %c0_i32, %c0_i32_0 : i32, i32
  }
  func.func @transform_5(%arg0: i32) -> (i32, i32) {
    %c0_i32 = arith.constant 0 : i32
    %c0_i32_0 = arith.constant 0 : i32
    %c0_i32_1 = arith.constant 0 : i32
    return %c0_i32, %c0_i32_0 : i32, i32
  }
  func.func @transform_6(%arg0: i32) -> (i32, i32) {
    %c0_i32 = arith.constant 0 : i32
    %c0_i32_0 = arith.constant 0 : i32
    %c0_i32_1 = arith.constant 0 : i32
    return %c0_i32, %c0_i32_0 : i32, i32
  }
  func.func @transform_7(%arg0: i32) -> (i32, i32) {
    %c0_i32 = arith.constant 0 : i32
    %c0_i32_0 = arith.constant 0 : i32
    %c0_i32_1 = arith.constant 0 : i32
    return %c0_i32, %c0_i32_0 : i32, i32
  }
  func.func @transform_8(%arg0: i32) -> (i32, i32) {
    %c0_i32 = arith.constant 0 : i32
    %c0_i32_0 = arith.constant 0 : i32
    %c0_i32_1 = arith.constant 0 : i32
    return %c0_i32, %c0_i32_0 : i32, i32
  }
  func.func @transform_9(%arg0: i32) -> (i32, i32) {
    %c0_i32 = arith.constant 0 : i32
    %c0_i32_0 = arith.constant 0 : i32
    %c0_i32_1 = arith.constant 0 : i32
    return %c0_i32, %c0_i32_0 : i32, i32
  }
  func.func @transform_10(%arg0: i32) -> (i32, i32) {
    %c0_i32 = arith.constant 0 : i32
    %c0_i32_0 = arith.constant 0 : i32
    %c0_i32_1 = arith.constant 0 : i32
    return %c0_i32, %c0_i32_0 : i32, i32
  }
  func.func @transform_11(%arg0: i32) -> (i32, i32) {
    %c0_i32 = arith.constant 0 : i32
    %c0_i32_0 = arith.constant 0 : i32
    %c0_i32_1 = arith.constant 0 : i32
    return %c0_i32, %c0_i32_0 : i32, i32
  }
  func.func @transform_12(%arg0: i32) -> (i32, i32) {
    %c0_i32 = arith.constant 0 : i32
    %c0_i32_0 = arith.constant 0 : i32
    %c0_i32_1 = arith.constant 0 : i32
    return %c0_i32, %c0_i32_0 : i32, i32
  }
  func.func @transform_13(%arg0: i32) -> (i32, i32) {
    %c0_i32 = arith.constant 0 : i32
    %c0_i32_0 = arith.constant 0 : i32
    return %c0_i32, %arg0 : i32, i32
  }
}

</mosaic_0001>

<bundles_post_ra>
// kernel: tpu_custom_call.1
= control target key start
LH: loop header
LB: loop body
LE: loop exit
PB: predicated region body
PF: predicated region fallthrough
CT: control target
= control target key end

     0   :  { %vm87_vm0 = vcmask 130048   ;;  %v637_v4 = vmov 0   ;;  %s822_s0 = inlined_call_operand.vmem [shape: f32[16,128], index: 0, kind: input, shape index: {}]   ;;  %s823_s1 = inlined_call_operand.vmem [shape: bf16[32,16], index: 1, kind: input, shape index: {}]   ;;  %s824_s2 = inlined_call_operand.vmem [shape: f32[32,1], index: 2, kind: input, shape index: {}]   ;;  %s825_s3 = inlined_call_operand.vmem [shape: bf16[32,32], index: 3, kind: input, shape index: {}]   ;;  %s826_s4 = inlined_call_operand.vmem [shape: f32[32,1], index: 4, kind: input, shape index: {}]   ;;  %s827_s5 = inlined_call_operand.vmem [shape: bf16[32,32], index: 5, kind: input, shape index: {}]   ;;  %s828_s6 = inlined_call_operand.vmem [shape: f32[32,1], index: 6, kind: input, shape index: {}]   ;;  %s829_s7 = inlined_call_operand.vmem [shape: bf16[32,32], index: 7, kind: input, shape index: {}]   ;;  %s830_s8 = inlined_call_operand.vmem [shape: f32[32,1], index: 8, kind: input, shape index: {}]   ;;  %s831_s9 = inlined_call_operand.vmem [shape: bf16[8,32], index: 9, kind: input, shape index: {}]   ;;  %s832_s10 = inlined_call_operand.vmem [shape: f32[8,1], index: 10, kind: input, shape index: {}]   ;;  %s833_s11 = inlined_call_operand.vmem [shape: f32[8,1], index: 11, kind: input, shape index: {}]   ;;  %s834_s12 = inlined_call_operand.vmem [shape: f32[8,1], index: 12, kind: input, shape index: {}]   ;;  %s835_s13 = inlined_call_operand.hbm [shape: f32[8,128], index: 13, kind: output, shape index: {}]  }
   0x1   :  { %v46_v0 = vld [vmem:[%s822_s0] sm:$0xff]  ;;  %v47_v1 = vld [vmem:[%s822_s0 + $0x8] sm:$0xff]  ;;  %603 = vset.pattern.permute.xlu0 %v637_v4  ;;  %604 = vset.pattern.permute.xlu1 %v637_v4  ;;  %v55_v7 = vld [vmem:[%s824_s2 + $0x10] sm:$0xff] }
   0x2   :  { %v48_v2 = vpack.c.bf16 %v47_v1, %v46_v0  ;;  %v605_v3 = vld [vmem:[%s823_s1] sm:$0xff]   ;;  %v606_v6 = vld [vmem:[%s823_s1 + $0x8] sm:$0xff]   ;;  %69 = vperm.xlu1 %604, %v55_v7   ;;  %v56_v9 = vld [vmem:[%s824_s2 + $0x18] sm:$0xff] }
   0x3   :  { %v53_v5 = vld [vmem:[%s824_s2] sm:$0xff]  ;;  %563 = vmatprep.mubr.msk.bf16.mxu0 %vm87_vm0, %v605_v3  ;;  %v54_v8 = vld [vmem:[%s824_s2 + $0x8] sm:$0xff]  ;;  %v155_v12 = vld [vmem:[%s826_s4 + $0x10] sm:$0xff] }
   0x4   :  { %561 = vmatprep.subr.bf16.mxu0 %v48_v2  ;;  %59 = vperm.xlu0 %603, %v53_v5   ;;  %v153_v10 = vld [vmem:[%s826_s4] sm:$0xff]  ;;  %v154_v11 = vld [vmem:[%s826_s4 + $0x8] sm:$0xff] }
   0x5   :  { %562 = vmatpush3.bf16.msra.mxu0 %v48_v2 }
   0x6   :  { %74 = vperm.xlu1 %604, %v56_v9  }
   0x8   :  { %564 = vmatmul.mubr.msk.bf16.vlgmr.msra.gmra.mrb[0].mxu0 %vm87_vm0, %v606_v6  ;;  %64 = vperm.xlu0 %603, %v54_v8  }
   0xa   :  { %164 = vperm.xlu1 %604, %v154_v11  }
   0xc   :  { %159 = vperm.xlu0 %603, %v153_v10  }
   0xd   :  { %18 = vsyncpa [#allocation3], 0  ;;  %v156_v13 = vld [vmem:[%s826_s4 + $0x18] sm:$0xff]  ;;  %v253_v14 = vld [vmem:[%s828_s6] sm:$0xff]  ;;  %vm187_vm1 = vcmask 261120   ;;  %vm639_vm2 = vmmov 0  }
   0xe   :  { %174 = vperm.xlu1 %604, %v156_v13   ;;  %v254_v15 = vld [vmem:[%s828_s6 + $0x8] sm:$0xff]  ;;  %v255_v16 = vld [vmem:[%s828_s6 + $0x10] sm:$0xff]  ;;  %v256_v17 = vld [vmem:[%s828_s6 + $0x18] sm:$0xff]  ;;  %s640_s18 = smov [#allocation2]  }
   0xf   :  { %v352_v18 = vld [vmem:[%s830_s8] sm:$0xff]  ;;  %v353_v19 = vld [vmem:[%s830_s8 + $0x8] sm:$0xff]  ;;  %v354_v20 = vld [vmem:[%s830_s8 + $0x10] sm:$0xff]  ;;  %s518_s4 = sshll.u32 %s640_s18, 4  ;;  %s519_s4 = int_to_ptr.vmem [resolvable:$true] %s518_s4 }
  0x10   :  { %169 = vperm.xlu0 %603, %v155_v12   ;;  %v355_v21 = vld [vmem:[%s830_s8 + $0x18] sm:$0xff]  ;;  %v448_v22 = vld [vmem:[%s832_s10] sm:$0xff]  ;;  %v608_v44 = vld [vmem:[%s825_s3 + $0x8] sm:$0xff]   ;;  %s613_s19 = scalar_lea.vmem %s519_s4, 128  ;;  %p618_p1 = scmp.lt.s32.totalorder %s519_s4, %s519_s4 }
  0x11   :  { %v497_v23 = vld [vmem:[%s833_s11] sm:$0xff]  ;;  %v610_v0 = vld [vmem:[%s827_s5 + $0x8] sm:$0xff]   ;;  %p614_p0 = scmp.ne.s32.totalorder %s519_s4, %s613_s19  ;;  %p619_p2 = scmp.lt.s32.totalorder %s613_s19, %s613_s19 }
  0x12   :  { %264 = vperm.xlu1 %604, %v254_v15   ;;  %v504_v24 = vld [vmem:[%s834_s12] sm:$0xff] }
  0x13   :  { %v607_v25 = vld [vmem:[%s825_s3] sm:$0xff]   ;;  %p620_p3 = por %p619_p2, %p618_p1 }
  0x14   :  { %259 = vperm.xlu0 %603, %v253_v14   ;;  %571 = vmatprep.mubr.msk.bf16.mxu1 %vm187_vm1, %v607_v25  ;;  %v609_v45 = vld [vmem:[%s827_s5] sm:$0xff]  }
  0x15   :  { %579 = vmatprep.mubr.msk.bf16.mxu0 %vm187_vm1, %v609_v45  ;;  %v611_v1 = vld [vmem:[%s829_s7] sm:$0xff]   ;;  %p621_p4 = pnand %p620_p3, %p614_p0 }
  0x16   :  { %274 = vperm.xlu1 %604, %v256_v17  }
  0x18   :  { %269 = vperm.xlu0 %603, %v255_v16  }
  0x1a   :  { %363 = vperm.xlu1 %604, %v353_v19  }
  0x1c   :  { %358 = vperm.xlu0 %603, %v352_v18  }
  0x1e   :  { %373 = vperm.xlu1 %604, %v355_v21   ;;  %v638_v21 = vmov 0.0  }
  0x20   :  { %368 = vperm.xlu0 %603, %v354_v20   ;;  %v612_v20 = vld [vmem:[%s829_s7 + $0x8] sm:$0xff]  }
  0x22   :  { %500 = vperm.xlu1 %604, %v497_v23  }
  0x24   :  { %451 = vperm.xlu0 %603, %v448_v22  }
  0x28   :  { %507 = vperm.xlu0 %603, %v504_v24  }
  0x81   :  { %v70_v26 = vpop.permute.xlu1 %69 }
  0x83   :  { %v60_v27 = vpop.permute.xlu0 %59 }
  0x85   :  { %v75_v31 = vpop.permute.xlu1 %74 }
  0x87   :  { %v65_v34 = vpop.permute.xlu0 %64 }
  0x89   :  { %v165_v47 = vpop.permute.xlu1 %164 }
  0x8b   :  { %v160_v46 = vpop.permute.xlu0 %159 }
  0x8d   :  { %v175_v52 = vpop.permute.xlu1 %174 }
  0x8f   :  { %v170_v48 = vpop.permute.xlu0 %169 }
  0x91   :  { %v265_v3 = vpop.permute.xlu1 %264 }
  0x93   :  { %v260_v2 = vpop.permute.xlu0 %259 }
  0x95   :  { %v275_v8 = vpop.permute.xlu1 %274 }
  0x97   :  { %v270_v4 = vpop.permute.xlu0 %269 }
  0x99   :  { %v364_v23 = vpop.permute.xlu1 %363 }
  0x9b   :  { %v359_v22 = vpop.permute.xlu0 %358 }
  0x9f   :  { %v369_v24 = vpop.permute.xlu0 %368 }
  0xdb   :  { %v565_v28 = vpop.f32.mrb[0].mxu0 }
  0xdc   :  { %v137_v29 = vadd.f32 %v565_v28, %v70_v26  ;;  %v128_v30 = vpop.f32.mrb[1].mxu0  ;;  %v374_v28 = vpop.permute.xlu1 %373 }
  0xdd   :  { %v129_v32 = vadd.f32 %v128_v30, %v60_v27  ;;  %v566_v33 = vpop.f32.mrb[2].mxu0 }
  0xde   :  { %v140_v35 = vadd.f32 %v566_v33, %v75_v31  ;;  %v131_v36 = vpop.f32.mrb[3].mxu0  ;;  %v145_v38 = vmax.f32 %v137_v29, 0.0 }
  0xdf   :  { %v132_v37 = vadd.f32 %v131_v36, %v65_v34  ;;  %v143_v40 = vmax.f32 %v129_v32, 0.0 }
  0xe0   :  { %v146_v39 = vmax.f32 %v140_v35, 0.0  ;;  %v501_v45 = vpop.permute.xlu1 %500 }
  0xe1   :  { %v144_v41 = vmax.f32 %v132_v37, 0.0 }
  0xe2   :  { %v148_v42 = vpack.c.bf16 %v146_v39, %v145_v38 }
  0xe3   :  { %v147_v43 = vpack.c.bf16 %v144_v41, %v143_v40  ;;  %v447_v40 = vld [vmem:[%s831_s9] sm:$0xf]  ;;  %v452_v41 = vpop.permute.xlu0 %451 }
  0xe5   :  { %567 = vmatprep.subr.bf16.mxu1 %v147_v43 }
  0xe6   :  { %568 = vmatpush3.bf16.msra.mxu1 %v147_v43 }
  0xe7   :  { %569 = vmatprep.subr.bf16.mxu1 %v148_v42 }
  0xea   :  { %570 = vmatpush3.bf16.msra.mxu1 %v148_v42 }
  0xed   :  { %572 = vmatmul.mubr.msk.bf16.vlgmr.msra.gmra.mrb[0].mxu1 %vm187_vm1, %v608_v44 }
  0xee   :  { %587 = vmatprep.mubr.msk.bf16.mxu1 %vm187_vm1, %v611_v1 }
 0x1c0   :  { %v573_v49 = vpop.f32.mrb[0].mxu1 }
 0x1c1   :  { %v237_v50 = vadd.f32 %v573_v49, %v170_v48  ;;  %v228_v51 = vpop.f32.mrb[1].mxu1  ;;  %v508_v49 = vpop.permute.xlu0 %507 }
 0x1c2   :  { %v229_v53 = vadd.f32 %v228_v51, %v160_v46  ;;  %v574_v54 = vpop.f32.mrb[2].mxu1 }
 0x1c3   :  { %v240_v55 = vadd.f32 %v574_v54, %v175_v52  ;;  %v231_v56 = vpop.f32.mrb[3].mxu1  ;;  %v245_v58 = vmax.f32 %v237_v50, 0.0 }
 0x1c4   :  { %v232_v57 = vadd.f32 %v231_v56, %v165_v47  ;;  %v243_v60 = vmax.f32 %v229_v53, 0.0 }
 0x1c5   :  { %v246_v59 = vmax.f32 %v240_v55, 0.0 }
 0x1c6   :  { %v244_v61 = vmax.f32 %v232_v57, 0.0 }
 0x1c7   :  { %v248_v62 = vpack.c.bf16 %v246_v59, %v245_v58 }
 0x1c8   :  { %v247_v63 = vpack.c.bf16 %v244_v61, %v243_v60 }
 0x1ca   :  { %575 = vmatprep.subr.bf16.mxu0 %v247_v63 }
 0x1cb   :  { %576 = vmatpush3.bf16.msra.mxu0 %v247_v63 }
 0x1cc   :  { %577 = vmatprep.subr.bf16.mxu0 %v248_v62 }
 0x1cf   :  { %578 = vmatpush3.bf16.msra.mxu0 %v248_v62 }
 0x1d0   :  { %591 = vmatprep.subr.bf16.mxu0 %v638_v21 }
 0x1d2   :  { %580 = vmatmul.mubr.msk.bf16.vlgmr.msra.gmra.mrb[4].mxu0 %vm187_vm1, %v610_v0 }
 0x1d3   :  { %595 = vmatprep.mubr.msk.bf16.mxu0 %vm639_vm2, %v638_v21 }
 0x2a5   :  { %v581_v5 = vpop.f32.mrb[4].mxu0 }
 0x2a6   :  { %v336_v6 = vadd.f32 %v581_v5, %v270_v4  ;;  %v327_v7 = vpop.f32.mrb[5].mxu0 }
 0x2a7   :  { %v328_v9 = vadd.f32 %v327_v7, %v260_v2  ;;  %v582_v10 = vpop.f32.mrb[6].mxu0 }
 0x2a8   :  { %v339_v11 = vadd.f32 %v582_v10, %v275_v8  ;;  %v330_v12 = vpop.f32.mrb[7].mxu0  ;;  %v344_v14 = vmax.f32 %v336_v6, 0.0 }
 0x2a9   :  { %v331_v13 = vadd.f32 %v330_v12, %v265_v3  ;;  %v342_v16 = vmax.f32 %v328_v9, 0.0 }
 0x2aa   :  { %v345_v15 = vmax.f32 %v339_v11, 0.0 }
 0x2ab   :  { %v343_v17 = vmax.f32 %v331_v13, 0.0 }
 0x2ac   :  { %v347_v18 = vpack.c.bf16 %v345_v15, %v344_v14 }
 0x2ad   :  { %v346_v19 = vpack.c.bf16 %v343_v17, %v342_v16 }
 0x2af   :  { %583 = vmatprep.subr.bf16.mxu1 %v346_v19 }
 0x2b0   :  { %584 = vmatpush3.bf16.msra.mxu1 %v346_v19 }
 0x2b1   :  { %585 = vmatprep.subr.bf16.mxu1 %v347_v18 }
 0x2b4   :  { %586 = vmatpush3.bf16.msra.mxu1 %v347_v18 }
 0x2b7   :  { %588 = vmatmul.mubr.msk.bf16.vlgmr.msra.gmra.mrb[4].mxu1 %vm187_vm1, %v612_v20 }
 0x38a   :  { %v589_v25 = vpop.f32.mrb[4].mxu1 }
 0x38b   :  { %v435_v26 = vadd.f32 %v589_v25, %v369_v24  ;;  %v426_v27 = vpop.f32.mrb[5].mxu1 }
 0x38c   :  { %v427_v29 = vadd.f32 %v426_v27, %v359_v22  ;;  %v590_v30 = vpop.f32.mrb[6].mxu1 }
 0x38d   :  { %v438_v31 = vadd.f32 %v590_v30, %v374_v28  ;;  %v429_v32 = vpop.f32.mrb[7].mxu1  ;;  %v443_v34 = vmax.f32 %v435_v26, 0.0 }
 0x38e   :  { %v430_v33 = vadd.f32 %v429_v32, %v364_v23  ;;  %v441_v36 = vmax.f32 %v427_v29, 0.0 }
 0x38f   :  { %v444_v35 = vmax.f32 %v438_v31, 0.0 }
 0x390   :  { %v442_v37 = vmax.f32 %v430_v33, 0.0 }
 0x391   :  { %v446_v38 = vpack.c.bf16 %v444_v35, %v443_v34 }
 0x392   :  { %v445_v39 = vpack.c.bf16 %v442_v37, %v441_v36 }
 0x394   :  { %592 = vmatpush3.bf16.msra.mxu0 %v445_v39 }
 0x395   :  { %593 = vmatprep.subr.bf16.mxu0 %v638_v21 }
 0x398   :  { %594 = vmatpush3.bf16.msra.mxu0 %v446_v38 }
 0x39b   :  { %596 = vmatmul.mubr.msk.bf16.vlgmr.msra.gmra.mrb[8].mxu0 %vm187_vm1, %v447_v40 }
 0x46e   :  { %v491_v42 = vpop.f32.mrb[8].mxu0 }
 0x46f   :  { %v492_v43 = vadd.f32 %v491_v42, %v452_v41  ;;  %v597_v44 = vpop.f32.mrb[9].mxu0 }
 0x470   :  { %v494_v46 = vpop.f32.mrb[10].mxu0 }
 0x471   :  { %v503_v47 = vmin.f32 %v501_v45, %v492_v43  ;;  %v598_v48 = vpop.f32.mrb[11].mxu0 }
 0x473   :  { %v510_v50 = vmax.f32 %v503_v47, %v508_v49 }
 0x475   :  { %511 = vst [vmem:[#allocation2] sm:$0xff] %v510_v50 }
 0x476   :  { %624 = shalt.err (!%p621_p4)
}
 0x477   :  { %s625_s21 = scalar_lea.hbm %s835_s13, 128 }
 0x478   :  { %p626_p5 = scmp.ne.s32.totalorder %s835_s13, %s625_s21  ;;  %p629_p6 = scmp.lt.u32.totalorder %s625_s21, %s835_s13 }
 0x47a   :  { %p631_p7 = pnand %p629_p6, %p626_p5 }
 0x47c   :  { %634 = shalt.err (!%p631_p7)
}
 0x47d   :  { %521 = dma.vmem_to_hbm [thread:$0]  %s519_s4, 128, %s835_s13, [#allocation3]  }
 0x47e   :  { %635 = dma.done.wait [#allocation3], 128  }
 0x47f   :  { %636 = vsyncadd [#allocation3], 4294967168 }
 0x480   :  { %525 = vsyncpa [#allocation3], 1 }

</bundles_post_ra>
